<compile_context>
chip_gen: v6e
topology: v6e:2x2x1
jax: 0.10.0
libtpu: 0.0.40
codegen_flags: <defaults>
</compile_context>

<pallas_src>
import jax
import jax.numpy as jnp
import numpy as np
from jax.experimental import pallas as pl
from jax.experimental.pallas import tpu as pltpu

NEG_INF = -1e18


# --------------------------- kernels ---------------------------
def _attn_body(q, keys, vals, mask, w_a, score_ref, ctx_ref):
    # q:    (BB, D)   f32  (already projected for 'general'/'mlp')
    # keys: (BB, S, D)     native dtype
    # vals: (BB, S, D)     native dtype
    # mask: (BB, S)   f32  (0/1)
    # w_a:  (1, D)    f32  or None (mlp only)
    qf = q.astype(jnp.float32)

    if w_a is None:
        # dot / general: score_bs = sum_d q_bd * K_bsd  (batched, contracts D, no .T)
        score = jnp.einsum(
            "bqd,bsd->bqs", qf[:, None, :], keys,
            preferred_element_type=jnp.float32)[:, 0, :]                 # (BB, S)
    else:
        # mlp: score_bs = sum_d w_a[d] * tanh(qh_bd + K_bsd)
        hidden = jnp.tanh(qf[:, None, :] + keys.astype(jnp.float32))     # (BB, S, D)
        score = jnp.sum(hidden * w_a[None, :, :], axis=-1)               # lane reduce

    # Masked softmax over the sequence axis (f32), mirroring the PyTorch order:
    # fill -> softmax (denominator includes masked exp(~-1e18) == 0) -> zero.
    score = jnp.where(mask == 0, NEG_INF, score)
    score = score - jnp.max(score, axis=1, keepdims=True)
    e = jnp.exp(score)
    denom = jnp.sum(e, axis=1, keepdims=True)          # before zeroing -> all-masked rows stay finite
    p = e * pl.reciprocal(denom, approx=True)
    p = jnp.where(mask == 0, 0.0, p)

    # context vector: contracts S, no transpose of the (S,D) value tile.
    ctx = jnp.einsum(
        "bqs,bsd->bqd", p[:, None, :].astype(vals.dtype), vals,
        preferred_element_type=jnp.float32)[:, 0, :]                     # (BB, D)

    score_ref[...] = p.astype(score_ref.dtype)
    ctx_ref[...] = ctx.astype(ctx_ref.dtype)


def _attn_kernel_dot(q_ref, k_ref, v_ref, m_ref, score_ref, ctx_ref):
    _attn_body(q_ref[...], k_ref[...], v_ref[...], m_ref[...], None,
               score_ref, ctx_ref)


def _attn_kernel_mlp(q_ref, k_ref, v_ref, m_ref, wa_ref, score_ref, ctx_ref):
    _attn_body(q_ref[...], k_ref[...], v_ref[...], m_ref[...], wa_ref[...],
               score_ref, ctx_ref)


# --------------------------- wrapper ---------------------------
def _pad_to(x, n, axis, value=0.0):
    pad = n - x.shape[axis]
    if pad == 0:
        return x
    widths = [(0, 0)] * x.ndim
    widths[axis] = (0, pad)
    return jnp.pad(x, widths, constant_values=value)


def _round_up(n, m):
    return ((n + m - 1) // m) * m


def global_attention(query, memory_keys, memory_values, memory_masks,
                     params, attn_type="dot", block_batch=None):
    """Returns (attn_score (B, S), attn_memory (B, D)) — matches the PyTorch module."""
    B, S, D = memory_keys.shape

    # ---- hoist the query projection: one batched MXU matmul in XLA ----
    if attn_type == "dot":
        assert query.shape[1] == D
        qh = query.astype(jnp.float32)
    elif attn_type == "general":
        qh = query.astype(jnp.float32) @ params["w_in"].astype(jnp.float32).T
    elif attn_type == "mlp":
        qh = (query.astype(jnp.float32) @ params["w_q"].astype(jnp.float32).T
              + params["b_q"].astype(jnp.float32))
    else:
        raise ValueError(attn_type)

    keys = memory_keys              # keep native dtype (bf16 stays bf16)
    vals = memory_values
    masks = memory_masks.astype(jnp.float32)

    # ---- batch-block size: >=8 sublanes, largest block whose double-buffered
    #      working set stays inside the default scoped-VMEM limit everywhere ----
    kv_item = jnp.dtype(keys.dtype).itemsize
    if block_batch is None:
        budget = 12 << 20                     # <= v5e's 16 MiB default scoped VMEM
        bb = 8
        for cand in (128, 64, 32, 16, 8):
            per_block = (2 * cand * S * D * kv_item        # K + V tile
                         + cand * (D + S) * 4              # projected q + mask
                         + cand * (S + D) * 4)             # outputs
            if 2 * per_block <= budget:                    # x2 for double buffering
                bb = cand
                break
        block_batch = min(bb, _round_up(B, 8))
    BB = block_batch
    Bp = _round_up(B, BB)

    qh = _pad_to(qh, Bp, 0)
    keys = _pad_to(keys, Bp, 0)
    vals = _pad_to(vals, Bp, 0)
    masks = _pad_to(masks, Bp, 0, value=1.0)        # padded rows fully valid -> no NaN

    in_specs = [
        pl.BlockSpec((BB, D), lambda b: (b, 0)),        # projected query
        pl.BlockSpec((BB, S, D), lambda b: (b, 0, 0)),  # keys
        pl.BlockSpec((BB, S, D), lambda b: (b, 0, 0)),  # values
        pl.BlockSpec((BB, S), lambda b: (b, 0)),        # mask
    ]
    args = [qh, keys, vals, masks]
    if attn_type == "mlp":
        in_specs.append(pl.BlockSpec((1, D), lambda b: (0, 0)))
        args.append(params["w_a"].astype(jnp.float32))
        kernel = _attn_kernel_mlp
    else:
        kernel = _attn_kernel_dot

    out_specs = [
        pl.BlockSpec((BB, S), lambda b: (b, 0)),        # attn_score
        pl.BlockSpec((BB, D), lambda b: (b, 0)),        # attn_memory
    ]
    out_shape = (jax.ShapeDtypeStruct((Bp, S), jnp.float32),
                 jax.ShapeDtypeStruct((Bp, D), jnp.float32))

    # Raise the scoped VMEM limit only if a caller-forced block needs it;
    # clamp to 48 MiB so we never exceed v7x's 64 MiB physical VMEM.
    per_block = (2 * BB * S * D * kv_item      # K + V
                 + BB * (D + S) * 4            # qh + mask
                 + BB * (S + D) * 4)           # outputs
    need = 2 * per_block + (4 << 20)
    cp_kwargs = dict(dimension_semantics=("parallel",))
    if need > (16 << 20):
        cp_kwargs["vmem_limit_bytes"] = int(min(need, 48 << 20))

    score, ctx = pl.pallas_call(
        kernel,
        grid=(Bp // BB,),
        in_specs=in_specs,
        out_specs=out_specs,
        out_shape=out_shape,
        compiler_params=pltpu.CompilerParams(**cp_kwargs),
    )(*args)

    # TODO(synk): if production attn_size < 128, pad D to 128 (or pack heads along
    # lanes) upstream so vregs / MXU contraction aren't mostly empty.
    return score[:B], ctx[:B]


# ---------------- pure-JAX reference (mirrors the PyTorch forward) ----------------
def reference(query, keys, vals, masks, params, attn_type):
    if attn_type == "dot":
        score = jnp.einsum("bd,bsd->bs", query, keys)
    elif attn_type == "general":
        qh = query @ params["w_in"].T
        score = jnp.einsum("bd,bsd->bs", qh, keys)
    else:  # mlp
        qh = query @ params["w_q"].T + params["b_q"]
        hidden = jnp.tanh(qh[:, None, :] + keys)
        score = jnp.einsum("bsd,d->bs", hidden, params["w_a"][0])
    score = score * masks
    score = jnp.where(masks == 0, NEG_INF, score)
    score = jax.nn.softmax(score, axis=1)
    score = jnp.where(masks == 0, 0.0, score)
    ctx = jnp.einsum("bs,bsd->bd", score, vals)
    return score, ctx


if __name__ == "__main__":
    B, S, D = 4, 8, 32          # batch, seq_len, attn_size
    Dq = D                       # query_size (== attn_size, required for 'dot')

    key = jax.random.PRNGKey(0)
    kq, kk, kv, km, kw1, kw2, kb, kwa = jax.random.split(key, 8)

    query = jax.random.normal(kq, (B, Dq), dtype=jnp.float32)
    memory_keys = jax.random.normal(kk, (B, S, D), dtype=jnp.float32)
    memory_values = jax.random.normal(kv, (B, S, D), dtype=jnp.float32)
    lengths = jax.random.randint(km, (B,), 1, S + 1)
    memory_masks = (jnp.arange(S)[None, :] < lengths[:, None]).astype(jnp.float32)

    # parameter shapes follow nn.Linear in __init__
    params = {
        "w_in": 0.1 * jax.random.normal(kw1, (D, Dq), dtype=jnp.float32),   # linear_in.weight
        "w_q": 0.1 * jax.random.normal(kw2, (D, Dq), dtype=jnp.float32),    # linear_query.weight
        "b_q": 0.1 * jax.random.normal(kb, (D,), dtype=jnp.float32),        # linear_query.bias
        "w_a": 0.1 * jax.random.normal(kwa, (1, D), dtype=jnp.float32),     # attn_w.weight
    }

    # tolerances account for the EUP approximate reciprocal in the softmax denominator
    RTOL, ATOL = 5e-3, 1e-4

    for attn_type in ("dot", "general", "mlp"):
        score, ctx = global_attention(query, memory_keys, memory_values,
                                      memory_masks, params, attn_type)
        jax.block_until_ready((score, ctx))
        ref_score, ref_ctx = reference(query, memory_keys, memory_values,
                                       memory_masks, params, attn_type)
        np.testing.assert_allclose(np.asarray(score), np.asarray(ref_score),
                                   rtol=RTOL, atol=ATOL)
        np.testing.assert_allclose(np.asarray(ctx), np.asarray(ref_ctx),
                                   rtol=RTOL, atol=ATOL)

    # exercise batch padding + multiple grid steps with an explicit small batch block
    B2 = 12
    k2q, k2k, k2v, k2m = jax.random.split(jax.random.PRNGKey(1), 4)
    q2 = jax.random.normal(k2q, (B2, Dq), dtype=jnp.float32)
    keys2 = jax.random.normal(k2k, (B2, S, D), dtype=jnp.float32)
    vals2 = jax.random.normal(k2v, (B2, S, D), dtype=jnp.float32)
    len2 = jax.random.randint(k2m, (B2,), 1, S + 1)
    masks2 = (jnp.arange(S)[None, :] < len2[:, None]).astype(jnp.float32)
    score2, ctx2 = global_attention(q2, keys2, vals2, masks2, params,
                                    "general", block_batch=8)
    jax.block_until_ready((score2, ctx2))
    ref_score2, ref_ctx2 = reference(q2, keys2, vals2, masks2, params, "general")
    np.testing.assert_allclose(np.asarray(score2), np.asarray(ref_score2),
                               rtol=RTOL, atol=ATOL)
    np.testing.assert_allclose(np.asarray(ctx2), np.asarray(ref_ctx2),
                               rtol=RTOL, atol=ATOL)

    # exercise bf16 K/V (native-dtype pass-through halves HBM traffic)
    score3, ctx3 = global_attention(query, memory_keys.astype(jnp.bfloat16),
                                    memory_values.astype(jnp.bfloat16),
                                    memory_masks, params, "dot")
    jax.block_until_ready((score3, ctx3))
    ref_score3, ref_ctx3 = reference(query, memory_keys.astype(jnp.float32),
                                     memory_values.astype(jnp.float32),
                                     memory_masks, params, "dot")
    np.testing.assert_allclose(np.asarray(score3), np.asarray(ref_score3),
                               rtol=2e-2, atol=2e-2)
    np.testing.assert_allclose(np.asarray(ctx3), np.asarray(ref_ctx3),
                               rtol=2e-2, atol=2e-2)

    print("KERNEL_OK")
</pallas_src>

<mosaic_0001>
module attributes {stable_mosaic.version = 11 : i64} {
  func.func @_attn_kernel_dot(%arg0: i32, %arg1: memref<8x32xf32, #tpu.memory_space<vmem>>, %arg2: memref<8x8x32xf32, #tpu.memory_space<vmem>>, %arg3: memref<8x8x32xf32, #tpu.memory_space<vmem>>, %arg4: memref<8x8xf32, #tpu.memory_space<vmem>>, %arg5: memref<8x8xf32, #tpu.memory_space<vmem>>, %arg6: memref<8x32xf32, #tpu.memory_space<vmem>>) attributes {dimension_semantics = [#tpu.dimension_semantics<parallel>], iteration_bounds = array<i64: 1>, scalar_prefetch = 0 : i64, scratch_operands = 0 : i64, tpu.core_type = #tpu.core_type<tc>, window_params = [{transform_indices = @transform_0, window_bounds = array<i64: 8, 32>}, {transform_indices = @transform_1, window_bounds = array<i64: 8, 8, 32>}, {transform_indices = @transform_2, window_bounds = array<i64: 8, 8, 32>}, {transform_indices = @transform_3, window_bounds = array<i64: 8, 8>}, {transform_indices = @transform_4, window_bounds = array<i64: 8, 8>}, {transform_indices = @transform_5, window_bounds = array<i64: 8, 32>}]} {
    %c0 = arith.constant 0 : index
    %c0_0 = arith.constant 0 : index
    %0 = vector.load %arg1[%c0, %c0_0] : memref<8x32xf32, #tpu.memory_space<vmem>>, vector<8x32xf32>
    %c0_1 = arith.constant 0 : index
    %c0_2 = arith.constant 0 : index
    %c0_3 = arith.constant 0 : index
    %1 = vector.load %arg2[%c0_1, %c0_2, %c0_3] : memref<8x8x32xf32, #tpu.memory_space<vmem>>, vector<8x8x32xf32>
    %c0_4 = arith.constant 0 : index
    %c0_5 = arith.constant 0 : index
    %c0_6 = arith.constant 0 : index
    %2 = vector.load %arg3[%c0_4, %c0_5, %c0_6] : memref<8x8x32xf32, #tpu.memory_space<vmem>>, vector<8x8x32xf32>
    %c0_7 = arith.constant 0 : index
    %c0_8 = arith.constant 0 : index
    %3 = vector.load %arg4[%c0_7, %c0_8] : memref<8x8xf32, #tpu.memory_space<vmem>>, vector<8x8xf32>
    %4 = vector.shape_cast %0 : vector<8x32xf32> to vector<8x1x32xf32>
    "tpu.trace_start"() <{level = 10 : i32, message = "bqd,bsd->bqs"}> : () -> ()
    %cst = arith.constant dense<0.000000e+00> : vector<8x1x8xf32>
    %5 = tpu.matmul %4, %1, %cst {dimension_numbers = #tpu.dot_dimension_numbers<[2], [2], [1], [1], [0, 0, 0, 1, 1, 1], [0], [0]>} : vector<8x1x32xf32>, vector<8x8x32xf32>, vector<8x1x8xf32> -> vector<8x1x8xf32>
    "tpu.trace_stop"() : () -> ()
    %6 = vector.shape_cast %5 : vector<8x1x8xf32> to vector<8x8xf32>
    %cst_9 = arith.constant 0.000000e+00 : f32
    %7 = vector.broadcast %cst_9 : f32 to vector<8x8xf32>
    %8 = arith.cmpf oeq, %3, %7 : vector<8x8xf32>
    %cst_10 = arith.constant -9.99999984E+17 : f32
    %9 = vector.broadcast %cst_10 : f32 to vector<8x8xf32>
    %10 = arith.select %8, %9, %6 : vector<8x8xi1>, vector<8x8xf32>
    %cst_11 = arith.constant dense<0xFF800000> : vector<8xf32>
    %11 = vector.multi_reduction <maximumf>, %10, %cst_11 [1] : vector<8x8xf32> to vector<8xf32>
    %12 = vector.shape_cast %11 : vector<8xf32> to vector<8x1xf32>
    %13 = vector.broadcast %12 : vector<8x1xf32> to vector<8x8xf32>
    %14 = arith.subf %10, %13 : vector<8x8xf32>
    %15 = math.exp %14 : vector<8x8xf32>
    %cst_12 = arith.constant dense<0.000000e+00> : vector<8xf32>
    %16 = vector.multi_reduction <add>, %15, %cst_12 [1] : vector<8x8xf32> to vector<8xf32>
    %17 = vector.shape_cast %16 : vector<8xf32> to vector<8x1xf32>
    %18 = tpu.reciprocal %17 {approx = true} : vector<8x1xf32> -> vector<8x1xf32>
    %19 = vector.broadcast %18 : vector<8x1xf32> to vector<8x8xf32>
    %20 = arith.mulf %15, %19 : vector<8x8xf32>
    %cst_13 = arith.constant 0.000000e+00 : f32
    %21 = vector.broadcast %cst_13 : f32 to vector<8x8xf32>
    %22 = arith.cmpf oeq, %3, %21 : vector<8x8xf32>
    %cst_14 = arith.constant 0.000000e+00 : f32
    %23 = vector.broadcast %cst_14 : f32 to vector<8x8xf32>
    %24 = arith.select %22, %23, %20 : vector<8x8xi1>, vector<8x8xf32>
    %25 = vector.shape_cast %24 : vector<8x8xf32> to vector<8x1x8xf32>
    "tpu.trace_start"() <{level = 10 : i32, message = "bqs,bsd->bqd"}> : () -> ()
    %cst_15 = arith.constant dense<0.000000e+00> : vector<8x1x32xf32>
    %26 = tpu.matmul %25, %2, %cst_15 {dimension_numbers = #tpu.dot_dimension_numbers<[2], [1], [1], [2], [0, 0, 0, 1, 1, 2], [0], [0]>} : vector<8x1x8xf32>, vector<8x8x32xf32>, vector<8x1x32xf32> -> vector<8x1x32xf32>
    "tpu.trace_stop"() : () -> ()
    %27 = vector.shape_cast %26 : vector<8x1x32xf32> to vector<8x32xf32>
    %c0_16 = arith.constant 0 : index
    %c0_17 = arith.constant 0 : index
    %28 = vector.load %arg5[%c0_16, %c0_17] : memref<8x8xf32, #tpu.memory_space<vmem>>, vector<8x8xf32>
    tpu.vector_store %arg5[%c0_16, %c0_17], %24 {strides = array<i32>} : memref<8x8xf32, #tpu.memory_space<vmem>>, vector<8x8xf32>,
    %c0_18 = arith.constant 0 : index
    %c0_19 = arith.constant 0 : index
    %29 = vector.load %arg6[%c0_18, %c0_19] : memref<8x32xf32, #tpu.memory_space<vmem>>, vector<8x32xf32>
    tpu.vector_store %arg6[%c0_18, %c0_19], %27 {strides = array<i32>} : memref<8x32xf32, #tpu.memory_space<vmem>>, vector<8x32xf32>,
    return
  }
  func.func @transform_0(%arg0: i32) -> (i32, i32) {
    %c0_i32 = arith.constant 0 : i32
    %c0_i32_0 = arith.constant 0 : i32
    return %arg0, %c0_i32 : i32, i32
  }
  func.func @transform_1(%arg0: i32) -> (i32, i32, i32) {
    %c0_i32 = arith.constant 0 : i32
    %c0_i32_0 = arith.constant 0 : i32
    %c0_i32_1 = arith.constant 0 : i32
    return %arg0, %c0_i32, %c0_i32_0 : i32, i32, i32
  }
  func.func @transform_2(%arg0: i32) -> (i32, i32, i32) {
    %c0_i32 = arith.constant 0 : i32
    %c0_i32_0 = arith.constant 0 : i32
    %c0_i32_1 = arith.constant 0 : i32
    return %arg0, %c0_i32, %c0_i32_0 : i32, i32, i32
  }
  func.func @transform_3(%arg0: i32) -> (i32, i32) {
    %c0_i32 = arith.constant 0 : i32
    %c0_i32_0 = arith.constant 0 : i32
    return %arg0, %c0_i32 : i32, i32
  }
  func.func @transform_4(%arg0: i32) -> (i32, i32) {
    %c0_i32 = arith.constant 0 : i32
    %c0_i32_0 = arith.constant 0 : i32
    return %arg0, %c0_i32 : i32, i32
  }
  func.func @transform_5(%arg0: i32) -> (i32, i32) {
    %c0_i32 = arith.constant 0 : i32
    %c0_i32_0 = arith.constant 0 : i32
    return %arg0, %c0_i32 : i32, i32
  }
}

</mosaic_0001>

<bundles_post_ra>
// kernel: tpu_custom_call.1
= control target key start
LH: loop header
LB: loop body
LE: loop exit
PB: predicated region body
PF: predicated region fallthrough
CT: control target
= control target key end

     0   :  { %11 = vsyncpa [#allocation3], 0  ;;  %s1915_s0 = inlined_call_operand.hbm [shape: f32[8,32], index: 0, kind: input, shape index: {}]   ;;  %s1916_s1 = inlined_call_operand.hbm [shape: f32[8,8,32], index: 1, kind: input, shape index: {}]   ;;  %s1917_s2 = inlined_call_operand.hbm [shape: f32[8,8,32], index: 2, kind: input, shape index: {}]   ;;  %s1918_s3 = inlined_call_operand.hbm [shape: f32[8,8], index: 3, kind: input, shape index: {}]   ;;  %s1919_s4 = inlined_call_operand.hbm [shape: f32[8,8], index: 4, kind: output, shape index: {0}]   ;;  %s1920_s5 = inlined_call_operand.hbm [shape: f32[8,32], index: 5, kind: output, shape index: {1}]  }
   0x1   :  { %12 = vsyncpa [#allocation6], 0 }
   0x2   :  { %13 = vsyncpa [#allocation9], 0 }
   0x3   :  { %14 = vsyncpa [#allocation4], 0 }
   0x4   :  { %15 = vsyncpa [#allocation12], 0  ;;  %s1750_s18 = smov [#allocation5]  }
   0x5   :  { %s31_s19 = sshll.u32 %s1750_s18, 4  ;;  %s32_s19 = int_to_ptr.vmem [resolvable:$true] %s31_s19 }
   0x6   :  { %s1628_s20 = scalar_lea.vmem %s32_s19, 1024  ;;  %p1633_p1 = scmp.lt.s32.totalorder %s32_s19, %s32_s19 }
   0x7   :  { %p1629_p0 = scmp.ne.s32.totalorder %s32_s19, %s1628_s20  ;;  %p1634_p2 = scmp.lt.s32.totalorder %s1628_s20, %s1628_s20 }
   0x9   :  { %p1635_p3 = por %p1634_p2, %p1633_p1 }
   0xb   :  { %p1636_p4 = pnand %p1635_p3, %p1629_p0 }
   0xd   :  { %1639 = shalt.err (!%p1636_p4)
}
   0xe   :  { %s1751_s21 = smov 128   ;;  %s1752_s22 = smov 8  }
   0xf   :  { %37 = dma.hbm_to_vmem [thread:$0]  %s1916_s1, 1024, %s32_s19, [#allocation6], %s1751_s21, %s1751_s21, %s1752_s22  }
  0x10   :  { %s1753_s25 = smov [#allocation2]   ;;  %s1754_s27 = smov [#allocation7]  }
  0x11   :  { %s22_s26 = sshll.u32 %s1753_s25, 4  ;;  %s43_s28 = sshll.u32 %s1754_s27, 4  ;;  %s23_s26 = int_to_ptr.vmem [resolvable:$true] %s22_s26  ;;  %s44_s28 = int_to_ptr.vmem [resolvable:$true] %s43_s28 }
  0x12   :  { %s1648_s29 = scalar_lea.vmem %s23_s26, 128  ;;  %p1653_p6 = scmp.lt.s32.totalorder %s23_s26, %s23_s26 }
  0x13   :  { %p1649_p5 = scmp.ne.s32.totalorder %s23_s26, %s1648_s29  ;;  %p1654_p7 = scmp.lt.s32.totalorder %s1648_s29, %s1648_s29 }
  0x15   :  { %p1655_p8 = por %p1654_p7, %p1653_p6 }
  0x17   :  { %p1656_p9 = pnand %p1655_p8, %p1649_p5 }
  0x19   :  { %1659 = shalt.err (!%p1656_p9)
}
  0x1a   :  { %25 = dma.hbm_to_vmem [thread:$0]  %s1915_s0, 128, %s23_s26, [#allocation3]  }
  0x1b   :  { %s1668_s7 = scalar_lea.vmem %s44_s28, 1024  ;;  %p1673_p11 = scmp.lt.s32.totalorder %s44_s28, %s44_s28 }
  0x1c   :  { %p1669_p10 = scmp.ne.s32.totalorder %s44_s28, %s1668_s7  ;;  %p1674_p12 = scmp.lt.s32.totalorder %s1668_s7, %s1668_s7 }
  0x1e   :  { %p1675_p13 = por %p1674_p12, %p1673_p11 }
  0x20   :  { %p1676_p0 = pnand %p1675_p13, %p1669_p10 }
  0x22   :  { %1679 = shalt.err (!%p1676_p0)
}
  0x23   :  { %49 = dma.hbm_to_vmem [thread:$0]  %s1917_s2, 1024, %s44_s28, [#allocation6], %s1751_s21, %s1751_s21, %s1752_s22  }
  0x24   :  { %s1755_s9 = smov [#allocation8]  }
  0x25   :  { %s56_s10 = sshll.u32 %s1755_s9, 4  ;;  %s57_s10 = int_to_ptr.vmem [resolvable:$true] %s56_s10 }
  0x26   :  { %s1688_s11 = scalar_lea.vmem %s57_s10, 128  ;;  %p1693_p2 = scmp.lt.s32.totalorder %s57_s10, %s57_s10 }
  0x27   :  { %p1689_p1 = scmp.ne.s32.totalorder %s57_s10, %s1688_s11  ;;  %p1694_p3 = scmp.lt.s32.totalorder %s1688_s11, %s1688_s11 }
  0x29   :  { %p1695_p4 = por %p1694_p3, %p1693_p2 }
  0x2b   :  { %p1696_p5 = pnand %p1695_p4, %p1689_p1 }
  0x2d   :  { %1699 = shalt.err (!%p1696_p5)
}
  0x2e   :  { %59 = dma.hbm_to_vmem [thread:$0]  %s1918_s3, 128, %s57_s10, [#allocation9]  }
  0x2f   :  { %1740 = dma.done.wait [#allocation3], 128  }
  0x30   :  { %1741 = vsyncadd [#allocation3], 4294967168 }
  0x31   :  { %1742 = dma.done.wait [#allocation6], 2048  }
  0x32   :  { %1743 = vsyncadd [#allocation6], 4294965248 }
  0x33   :  { %1744 = dma.done.wait [#allocation9], 128  }
  0x34   :  { %1745 = vsyncadd [#allocation9], 4294967168  ;;  %v95_v0 = vlaneseq  ;;  %v1756_v1 = vmov 0.0   ;;  %vm1757_vm0 = vmmov 0   ;;  %v1758_v2 = vmov 1966171168  }
  0x35   :  { %1524 = vmatprep.subr.mxu0 %v1756_v1  ;;  %1529 = vmatprep.subr.mxu1 %v1756_v1  ;;  %v93_v3 = vunpack.c.l.s4 %v1758_v2  ;;  %vm140_vm1 = vcmask 261120   ;;  %v73_v7 = vld [vmem:[#allocation5] sm:$0xff]  ;;  %v74_v8 = vld [vmem:[#allocation5 + $0x8] sm:$0xff]  ;;  %v72_v9 = vld [vmem:[#allocation2] sm:$0xff]  ;;  %vm751_vm2 = vcmask 1041409   ;;  %vm754_vm3 = vcmask 1042434  }
  0x36   :  { %1526 = vmatprep.mubr.msk.f32.mxu0 %vm1757_vm0, %v1756_v1  ;;  %v96_v4 = vshrl.u32 %v95_v0, 7  ;;  %1531 = vmatprep.mubr.msk.f32.mxu1 %vm1757_vm0, %v1756_v1  ;;  %v91_v10 = vcombine.high %v72_v9, %v72_v9  ;;  %v75_v14 = vld [vmem:[#allocation5 + $0x10] sm:$0xff]  ;;  %v76_v18 = vld [vmem:[#allocation5 + $0x18] sm:$0xff]  ;;  %v77_v20 = vld [vmem:[#allocation5 + $0x20] sm:$0xff]  ;;  %vm757_vm4 = vcmask 1043459   ;;  %vm760_vm5 = vcmask 1044484  }
  0x37   :  { %v94_v5 = vunpack.c.0.s8 %v93_v3  ;;  %1525 = vmatpush3.xpose.msk.msra.mxu0 %vm140_vm1, %v73_v7  ;;  %1530 = vmatpush3.xpose.msk.msra.mxu1 %vm140_vm1, %v74_v8  ;;  %v78_v22 = vld [vmem:[#allocation5 + $0x28] sm:$0xff]  ;;  %v79_v24 = vld [vmem:[#allocation5 + $0x30] sm:$0xff]  ;;  %v80_v26 = vld [vmem:[#allocation5 + $0x38] sm:$0xff]  ;;  %vm763_vm6 = vcmask 1045509   ;;  %vm766_vm7 = vcmask 1046534   ;;  %vm769_vm8 = vcmask 1047559  }
  0x38   :  { %1534 = vmatprep.subr.mxu0 %v1756_v1  ;;  %1539 = vmatprep.subr.mxu1 %v1756_v1  ;;  %v89_v51 = vld [vmem:[#allocation8] sm:$0xff]  ;;  %vm773_vm10 = vcmask 64512   ;;  %s1759_s2 = smov [#allocation10]  }
  0x39   :  { %v1809_v6 = vsub.s32 %v94_v5, %v96_v4  ;;  %vm741_vm9 = vcmp.eq.f32.partialorder %v89_v51, 0.0  ;;  %v81_v4 = vld [vmem:[#allocation7] sm:$0xff]  ;;  %v82_v5 = vld [vmem:[#allocation7 + $0x8] sm:$0xff]  ;;  %s1443_s3 = sshll.u32 %s1759_s2, 4  ;;  %s1444_s3 = int_to_ptr.vmem [resolvable:$true] %s1443_s3 }
  0x3a   :  { %s1700_s13 = scalar_lea.vmem %s1444_s3, 128  ;;  %p1705_p7 = scmp.lt.s32.totalorder %s1444_s3, %s1444_s3 }
  0x3b   :  { %v98_v11 = vrot.slane %v72_v9, %v1809_v6  ;;  %v105_v12 = vrot.slane %v91_v10, %v1809_v6  ;;  %p1701_p6 = scmp.ne.s32.totalorder %s1444_s3, %s1700_s13  ;;  %p1706_p8 = scmp.lt.s32.totalorder %s1700_s13, %s1700_s13 }
  0x3d   :  { %v114_v13 = vrot.slane %v98_v11, %v1809_v6  ;;  %v106_v15 = vcombine.high %v98_v11, %v98_v11  ;;  %v107_v21 = vcombine.high %v105_v12, %v105_v12  ;;  %v121_v23 = vrot.slane %v105_v12, %v1809_v6  ;;  %p1707_p9 = por %p1706_p8, %p1705_p7 }
  0x3f   :  { %v136_v16 = vcombine.high %v114_v13, %v114_v13  ;;  %1527 = vmatmul.mubr.msk.f32.vlgmr.msra.gmra.mxu0 %vm140_vm1, %v114_v13  ;;  %v128_v17 = vrot.slane %v106_v15, %v1809_v6  ;;  %v135_v25 = vrot.slane %v107_v21, %v1809_v6  ;;  %v137_v27 = vcombine.high %v121_v23, %v121_v23  ;;  %p1708_p10 = pnand %p1707_p9, %p1701_p6 }
  0x40   :  { %1535 = vmatpush3.xpose.msk.msra.mxu0 %vm140_vm1, %v75_v14  ;;  %1536 = vmatprep.mubr.msk.f32.mxu0 %vm1757_vm0, %v1756_v1  ;;  %v83_v14 = vld [vmem:[#allocation7 + $0x10] sm:$0xff] }
  0x41   :  { %v138_v19 = vcombine.high %v128_v17, %v128_v17  ;;  %1532 = vmatmul.mubr.msk.f32.vlgmr.msra.gmra.mxu1 %vm140_vm1, %v128_v17  ;;  %1544 = vmatprep.subr.mxu0 %v1756_v1  ;;  %v139_v28 = vcombine.high %v135_v25, %v135_v25  ;;  %v84_v17 = vld [vmem:[#allocation7 + $0x18] sm:$0xff] }
  0x42   :  { %1540 = vmatpush3.xpose.msk.msra.mxu1 %vm140_vm1, %v76_v18  ;;  %1541 = vmatprep.mubr.msk.f32.mxu1 %vm1757_vm0, %v1756_v1 }
  0x43   :  { %1537 = vmatmul.mubr.msk.f32.vlgmr.msra.gmra.mxu0 %vm140_vm1, %v136_v16  ;;  %1549 = vmatprep.subr.mxu1 %v1756_v1 }
  0x44   :  { %1545 = vmatpush3.xpose.msk.msra.mxu0 %vm140_vm1, %v77_v20  ;;  %1546 = vmatprep.mubr.msk.f32.mxu0 %vm1757_vm0, %v1756_v1  ;;  %v85_v20 = vld [vmem:[#allocation7 + $0x20] sm:$0xff] }
  0x45   :  { %1542 = vmatmul.mubr.msk.f32.vlgmr.msra.gmra.mxu1 %vm140_vm1, %v138_v19  ;;  %1554 = vmatprep.subr.mxu0 %v1756_v1 }
  0x46   :  { %1550 = vmatpush3.xpose.msk.msra.mxu1 %vm140_vm1, %v78_v22  ;;  %1551 = vmatprep.mubr.msk.f32.mxu1 %vm1757_vm0, %v1756_v1  ;;  %v86_v22 = vld [vmem:[#allocation7 + $0x28] sm:$0xff] }
  0x47   :  { %1547 = vmatmul.mubr.msk.f32.vlgmr.msra.gmra.mxu0 %vm140_vm1, %v121_v23  ;;  %1559 = vmatprep.subr.mxu1 %v1756_v1 }
  0x48   :  { %1555 = vmatpush3.xpose.msk.msra.mxu0 %vm140_vm1, %v79_v24  ;;  %1556 = vmatprep.mubr.msk.f32.mxu0 %vm1757_vm0, %v1756_v1 }
  0x49   :  { %1552 = vmatmul.mubr.msk.f32.vlgmr.msra.gmra.mxu1 %vm140_vm1, %v135_v25  ;;  %1564 = vmatprep.subr.mxu0 %v1756_v1  ;;  %v87_v25 = vld [vmem:[#allocation7 + $0x30] sm:$0xff] }
  0x4a   :  { %1560 = vmatpush3.xpose.msk.msra.mxu1 %vm140_vm1, %v80_v26  ;;  %1561 = vmatprep.mubr.msk.f32.mxu1 %vm1757_vm0, %v1756_v1 }
  0x4b   :  { %1557 = vmatmul.mubr.msk.f32.vlgmr.msra.gmra.mxu0 %vm140_vm1, %v137_v27  ;;  %1569 = vmatprep.subr.mxu1 %v1756_v1  ;;  %v88_v27 = vld [vmem:[#allocation7 + $0x38] sm:$0xff] }
  0x4c   :  { %1566 = vmatprep.mubr.msk.f32.mxu0 %vm1757_vm0, %v1756_v1  ;;  %1565 = vmatpush3.msra.mxu0 %v81_v4 }
  0x4d   :  { %1562 = vmatmul.mubr.msk.f32.vlgmr.msra.gmra.mxu1 %vm140_vm1, %v139_v28  ;;  %1574 = vmatprep.subr.mxu0 %v1756_v1 }
  0x4e   :  { %1571 = vmatprep.mubr.msk.f32.mxu1 %vm1757_vm0, %v1756_v1  ;;  %1570 = vmatpush3.msra.mxu1 %v82_v5 }
  0x4f   :  { %1579 = vmatprep.subr.mxu1 %v1756_v1 }
  0xff   :  { %v212_v29 = vpop.f32.mrf.mxu0 }
 0x101   :  { %v1528_v30 = vpop.f32.mrf.mxu0  ;;  %v287_v31 = vpop.f32.mrf.mxu1 }
 0x102   :  { %v750_v32 = vrot.slane %v287_v31, 7 }
 0x103   :  { %v1533_v33 = vpop.f32.mrf.mxu1  ;;  %v362_v34 = vpop.f32.mrf.mxu0 }
 0x104   :  { %v752_v35 = vsel %vm751_vm2, %v750_v32, %v212_v29  ;;  %v753_v36 = vrot.slane %v362_v34, 6 }
 0x105   :  { %v1538_v37 = vpop.f32.mrf.mxu0  ;;  %v437_v38 = vpop.f32.mrf.mxu1 }
 0x106   :  { %v755_v39 = vsel %vm754_vm3, %v753_v36, %v752_v35  ;;  %v756_v40 = vrot.slane %v437_v38, 5 }
 0x107   :  { %v1543_v41 = vpop.f32.mrf.mxu1  ;;  %v512_v42 = vpop.f32.mrf.mxu0 }
 0x108   :  { %v758_v43 = vsel %vm757_vm4, %v756_v40, %v755_v39  ;;  %v759_v44 = vrot.slane %v512_v42, 4 }
 0x109   :  { %v1548_v45 = vpop.f32.mrf.mxu0  ;;  %v587_v46 = vpop.f32.mrf.mxu1 }
 0x10a   :  { %v761_v47 = vsel %vm760_vm5, %v759_v44, %v758_v43  ;;  %v762_v48 = vrot.slane %v587_v46, 3 }
 0x10b   :  { %v1553_v49 = vpop.f32.mrf.mxu1  ;;  %v662_v50 = vpop.f32.mrf.mxu0 }
 0x10c   :  { %v764_v52 = vsel %vm763_vm6, %v762_v48, %v761_v47  ;;  %v765_v53 = vrot.slane %v662_v50, 2 }
 0x10d   :  { %v1558_v54 = vpop.f32.mrf.mxu0  ;;  %v737_v55 = vpop.f32.mrf.mxu1 }
 0x10e   :  { %v768_v56 = vrot.slane %v737_v55, 1  ;;  %v767_v57 = vsel %vm766_vm7, %v765_v53, %v764_v52 }
 0x10f   :  { %v1563_v58 = vpop.f32.mrf.mxu1 }
 0x110   :  { %v770_v59 = vsel %vm769_vm8, %v768_v56, %v767_v57 }
 0x111   :  { %v772_v60 = vsel %vm741_vm9, -1e+18, %v770_v59 }
 0x112   :  { %v774_v61 = vsel %vm773_vm10, %v772_v60, -inf }
 0x113   :  { %775 = vmax.xlane.f32.xlu0 %v774_v61 }
 0x19c   :  { %v776_v62 = vpop.xlane.xlu0 %775 }
 0x19d   :  { %v777_v63 = vsub.f32 %v772_v60, %v776_v62 }
 0x19f   :  { %v778_v0 = vmul.f32 1.442695, %v777_v63 }
 0x1a1   :  { %1616 = vpow2.f32 %v778_v0 }
 0x1ae   :  { %v1617_v2 = vpop.eup %1616 }
 0x1af   :  { %v780_v3 = vsel %vm773_vm10, %v1617_v2, 0.0 }
 0x1b0   :  { %781 = vadd.xlane.f32.xlu0 %v780_v3 }
 0x239   :  { %v782_v7 = vpop.xlane.xlu0 %781 }
 0x23a   :  { %1618 = vrcp.f32 %v782_v7 }
 0x247   :  { %v1619_v8 = vpop.eup %1618 }
 0x248   :  { %v784_v9 = vmul.f32 %v1619_v8, %v1617_v2 }
 0x24a   :  { %v785_v10 = vsel %vm741_vm9, 0.0, %v784_v9 }
 0x24b   :  { %1412 = vst.msk [vmem:[#allocation10] sm:$0xff] %vm773_vm10, %v785_v10  ;;  %v794_v11 = vrot.slane %v785_v10, %v1809_v6  ;;  %v787_v12 = vcombine.high %v785_v10, %v785_v10 }
 0x24d   :  { %v810_v13 = vrot.slane %v794_v11, %v1809_v6  ;;  %v802_v15 = vcombine.high %v794_v11, %v794_v11  ;;  %v801_v18 = vrot.slane %v787_v12, %v1809_v6 }
 0x24f   :  { %1567 = vmatmul.mubr.msk.f32.vlgmr.msra.gmra.mxu0 %vm773_vm10, %v810_v13  ;;  %v824_v16 = vrot.slane %v802_v15, %v1809_v6  ;;  %v832_v19 = vcombine.high %v810_v13, %v810_v13  ;;  %v803_v23 = vcombine.high %v801_v18, %v801_v18  ;;  %v817_v24 = vrot.slane %v801_v18, %v1809_v6 }
 0x250   :  { %1575 = vmatpush3.msra.mxu0 %v83_v14  ;;  %1576 = vmatprep.mubr.msk.f32.mxu0 %vm1757_vm0, %v1756_v1 }
 0x251   :  { %1572 = vmatmul.mubr.msk.f32.vlgmr.msra.gmra.mxu1 %vm773_vm10, %v824_v16  ;;  %1584 = vmatprep.subr.mxu0 %v1756_v1  ;;  %v834_v21 = vcombine.high %v824_v16, %v824_v16  ;;  %v831_v26 = vrot.slane %v803_v23, %v1809_v6  ;;  %v833_v28 = vcombine.high %v817_v24, %v817_v24 }
 0x252   :  { %1580 = vmatpush3.msra.mxu1 %v84_v17  ;;  %1581 = vmatprep.mubr.msk.f32.mxu1 %vm1757_vm0, %v1756_v1 }
 0x253   :  { %1577 = vmatmul.mubr.msk.f32.vlgmr.msra.gmra.mxu0 %vm773_vm10, %v832_v19  ;;  %1589 = vmatprep.subr.mxu1 %v1756_v1  ;;  %v835_v29 = vcombine.high %v831_v26, %v831_v26 }
 0x254   :  { %1585 = vmatpush3.msra.mxu0 %v85_v20  ;;  %1586 = vmatprep.mubr.msk.f32.mxu0 %vm1757_vm0, %v1756_v1 }
 0x255   :  { %1582 = vmatmul.mubr.msk.f32.vlgmr.msra.gmra.mxu1 %vm773_vm10, %v834_v21  ;;  %1594 = vmatprep.subr.mxu0 %v1756_v1 }
 0x256   :  { %1590 = vmatpush3.msra.mxu1 %v86_v22  ;;  %1591 = vmatprep.mubr.msk.f32.mxu1 %vm1757_vm0, %v1756_v1 }
 0x257   :  { %1587 = vmatmul.mubr.msk.f32.vlgmr.msra.gmra.mxu0 %vm773_vm10, %v817_v24  ;;  %1599 = vmatprep.subr.mxu1 %v1756_v1 }
 0x258   :  { %1595 = vmatpush3.msra.mxu0 %v87_v25  ;;  %1596 = vmatprep.mubr.msk.f32.mxu0 %vm1757_vm0, %v1756_v1 }
 0x259   :  { %1592 = vmatmul.mubr.msk.f32.vlgmr.msra.gmra.mxu1 %vm773_vm10, %v831_v26 }
 0x25a   :  { %1600 = vmatpush3.msra.mxu1 %v88_v27  ;;  %1601 = vmatprep.mubr.msk.f32.mxu1 %vm1757_vm0, %v1756_v1 }
 0x25b   :  { %1597 = vmatmul.mubr.msk.f32.vlgmr.msra.gmra.mxu0 %vm773_vm10, %v833_v28 }
 0x25d   :  { %1602 = vmatmul.mubr.msk.f32.vlgmr.msra.gmra.mxu1 %vm773_vm10, %v835_v29 }
 0x25e   :  { %1711 = shalt.err (!%p1708_p10)
}
 0x25f   :  { %1446 = dma.vmem_to_hbm [thread:$0]  %s1444_s3, 128, %s1919_s4, [#allocation4]  }
 0x260   :  { %s1760_s4 = smov [#allocation11]  }
 0x261   :  { %s1453_s16 = sshll.u32 %s1760_s4, 4  ;;  %s1454_s16 = int_to_ptr.vmem [resolvable:$true] %s1453_s16 }
 0x262   :  { %s1720_s17 = scalar_lea.vmem %s1454_s16, 128  ;;  %p1725_p12 = scmp.lt.s32.totalorder %s1454_s16, %s1454_s16 }
 0x263   :  { %p1721_p11 = scmp.ne.s32.totalorder %s1454_s16, %s1720_s17  ;;  %p1726_p13 = scmp.lt.s32.totalorder %s1720_s17, %s1720_s17 }
 0x265   :  { %p1727_p0 = por %p1726_p13, %p1725_p12 }
 0x267   :  { %p1728_p1 = pnand %p1727_p0, %p1721_p11 }
 0x30f   :  { %v904_v1 = vpop.f32.mrf.mxu0 }
 0x311   :  { %v1568_v6 = vpop.f32.mrf.mxu0  ;;  %v976_v30 = vpop.f32.mrf.mxu1 }
 0x312   :  { %v1421_v31 = vrot.slane %v976_v30, 7 }
 0x313   :  { %v1573_v32 = vpop.f32.mrf.mxu1  ;;  %v1048_v33 = vpop.f32.mrf.mxu0 }
 0x314   :  { %v1422_v34 = vsel %vm751_vm2, %v1421_v31, %v904_v1  ;;  %v1423_v35 = vrot.slane %v1048_v33, 6 }
 0x315   :  { %v1578_v36 = vpop.f32.mrf.mxu0  ;;  %v1120_v37 = vpop.f32.mrf.mxu1 }
 0x316   :  { %v1424_v38 = vsel %vm754_vm3, %v1423_v35, %v1422_v34  ;;  %v1425_v39 = vrot.slane %v1120_v37, 5 }
 0x317   :  { %v1583_v40 = vpop.f32.mrf.mxu1  ;;  %v1192_v41 = vpop.f32.mrf.mxu0 }
 0x318   :  { %v1426_v42 = vsel %vm757_vm4, %v1425_v39, %v1424_v38  ;;  %v1427_v43 = vrot.slane %v1192_v41, 4 }
 0x319   :  { %v1588_v44 = vpop.f32.mrf.mxu0  ;;  %v1264_v45 = vpop.f32.mrf.mxu1 }
 0x31a   :  { %v1428_v46 = vsel %vm760_vm5, %v1427_v43, %v1426_v42  ;;  %v1429_v47 = vrot.slane %v1264_v45, 3 }
 0x31b   :  { %v1593_v48 = vpop.f32.mrf.mxu1  ;;  %v1336_v49 = vpop.f32.mrf.mxu0 }
 0x31c   :  { %v1430_v50 = vsel %vm763_vm6, %v1429_v47, %v1428_v46  ;;  %v1431_v51 = vrot.slane %v1336_v49, 2 }
 0x31d   :  { %v1598_v52 = vpop.f32.mrf.mxu0  ;;  %v1408_v53 = vpop.f32.mrf.mxu1 }
 0x31e   :  { %v1432_v54 = vsel %vm766_vm7, %v1431_v51, %v1430_v50  ;;  %v1433_v55 = vrot.slane %v1408_v53, 1 }
 0x31f   :  { %v1603_v56 = vpop.f32.mrf.mxu1 }
 0x320   :  { %v1434_v57 = vsel %vm769_vm8, %v1433_v55, %v1432_v54 }
 0x321   :  { %1436 = vst.msk [vmem:[#allocation11] sm:$0xff] %vm140_vm1, %v1434_v57 }
 0x322   :  { %1731 = shalt.err (!%p1728_p1)
}
 0x323   :  { %1456 = dma.vmem_to_hbm [thread:$0]  %s1454_s16, 128, %s1920_s5, [#allocation12]  }
 0x324   :  { %1746 = dma.done.wait [#allocation4], 128  }
 0x325   :  { %1747 = vsyncadd [#allocation4], 4294967168 }
 0x326   :  { %1748 = dma.done.wait [#allocation12], 128  }
 0x327   :  { %1749 = vsyncadd [#allocation12], 4294967168 }
 0x328   :  { %1463 = vsyncpa [#allocation3], 1 }
 0x329   :  { %1464 = vsyncpa [#allocation6], 1 }
 0x32a   :  { %1465 = vsyncpa [#allocation9], 1 }
 0x32b   :  { %1466 = vsyncpa [#allocation4], 1 }
 0x32c   :  { %1467 = vsyncpa [#allocation12], 1 }

</bundles_post_ra>
